<compile_context>
chip_gen: v5e
topology: v5e:2x2
jax: 0.10.0
libtpu: 0.0.40
codegen_flags: <defaults>
</compile_context>

<pallas_src>
import functools

import numpy as np
import jax
import jax.numpy as jnp
from jax.experimental import pallas as pl
from jax.experimental.pallas import tpu as pltpu


def _decomp_kernel(w_ref, x_ref, res_ref, mean_ref, *, inv_k):
    # w_ref   : (L, L)   banded integer window-count matrix (VMEM resident)
    # x_ref   : (L, Ct)  one (batch, channel-tile) slab of the series
    # res_ref : (L, Ct)  residual    = x - moving_mean
    # mean_ref: (L, Ct)  moving_mean
    xf = x_ref[...].astype(jnp.float32)
    # Sliding-window sum as one MXU matmul.  HIGHEST precision preserves the
    # f32 accuracy of x (the weights themselves are exact small integers).
    mean = jnp.dot(
        w_ref[...],
        xf,
        precision=jax.lax.Precision.HIGHEST,
        preferred_element_type=jnp.float32,
    ) * inv_k
    # One f32 value feeds both outputs; cast exactly once at each store.
    mean_ref[...] = mean.astype(mean_ref.dtype)
    res_ref[...] = (xf - mean).astype(res_ref.dtype)


@functools.lru_cache(maxsize=None)
def _window_counts(L, kernel_size):
    """(L, L) banded matrix: W[i, j] = #times x[j] appears in window i of the
    replicate-padded series (edge replication folded into the boundary rows)."""
    pad = (kernel_size - 1) // 2
    W = np.zeros((L, L), dtype=np.float32)
    for i in range(L):
        for t in range(i - pad, i + pad + 1):
            W[i, min(max(t, 0), L - 1)] += 1.0
    return W


def series_decomp(x, kernel_size):
    """Pallas TPU series decomposition (stride=1 moving average).

    x: (B, L, C).  Returns (res, moving_mean), both (B, L, C), matching the
    PyTorch module: replicate-pad (kernel_size-1)//2 rows front/back along L,
    AvgPool1d(kernel_size, stride=1), res = x - moving_mean.
    """
    B, L, C = x.shape
    pad = (kernel_size - 1) // 2
    # For even kernel_size the PyTorch module shrinks L and `x - mean` would
    # not broadcast; require odd (as used in the papers).
    assert L + 2 * pad - kernel_size + 1 == L, "use an odd kernel_size"

    itemsize = jnp.dtype(x.dtype).itemsize

    # --- channel-tile selection with explicit VMEM accounting ---------------
    # Live VMEM ~= 2 buffers x (1 input + 2 output) blocks + 2 x W.  A ~24 MB
    # budget fits under the 32 MiB scoped limit on every generation, incl.
    # v7x's 64 MiB physical VMEM.
    budget = 24 * 1024 * 1024
    w_bytes = 2 * L * L * 4
    avail = max(budget - w_bytes, 6 * L * 128 * itemsize)
    max_ct = max(128, (avail // (6 * L * itemsize)) // 128 * 128)

    if C % 128 == 0:
        # Lane-dense channel tiles (encoder use: C = d_model = 128k multiples).
        m = C // 128
        ct = 128
        for d in range(m, 0, -1):
            if m % d == 0 and 128 * d <= max_ct:
                ct = 128 * d
                break
        n_c_tiles = C // ct
        # v7x has 2 TensorCores: make sure the "parallel" grid has >= 2 steps.
        if B == 1 and n_c_tiles == 1 and C % 256 == 0:
            ct = C // 2
            n_c_tiles = 2
    else:
        # Small / odd channel counts (C = 7 / 8 / 21 ...): take the whole
        # channel axis as one block (block dim == full array dim satisfies the
        # (8,128) rule and avoids any HBM-side padding pass).
        ct = C
        n_c_tiles = 1

    # TODO(synk): for very long series (L >~ 2k) the (L, L) weight matrix gets
    # large; tile the L axis with a (tile_L + 2*pad) halo of x instead.
    W = jnp.asarray(_window_counts(L, kernel_size))

    kernel = functools.partial(_decomp_kernel, inv_k=1.0 / kernel_size)

    res, mean = pl.pallas_call(
        kernel,
        out_shape=(
            jax.ShapeDtypeStruct((B, L, C), x.dtype),
            jax.ShapeDtypeStruct((B, L, C), x.dtype),
        ),
        grid_spec=pltpu.PrefetchScalarGridSpec(
            num_scalar_prefetch=0,
            grid=(B, n_c_tiles),
            in_specs=[
                pl.BlockSpec((L, L), lambda b, c: (0, 0)),          # W, VMEM-resident
                pl.BlockSpec((None, L, ct), lambda b, c: (b, 0, c)),
            ],
            out_specs=[
                pl.BlockSpec((None, L, ct), lambda b, c: (b, 0, c)),
                pl.BlockSpec((None, L, ct), lambda b, c: (b, 0, c)),
            ],
        ),
        compiler_params=pltpu.CompilerParams(
            dimension_semantics=("parallel", "parallel"),
            vmem_limit_bytes=32 * 1024 * 1024,
        ),
    )(W, x)

    return res, mean


def _reference(x, kernel_size):
    """Pure-JAX reference mirroring the PyTorch forward."""
    B, L, C = x.shape
    pad = (kernel_size - 1) // 2
    front = jnp.repeat(x[:, 0:1, :], pad, axis=1)
    end = jnp.repeat(x[:, L - 1:L, :], pad, axis=1)
    xpad = jnp.concatenate([front, x, end], axis=1)
    windows = jnp.stack(
        [xpad[:, i:i + L, :] for i in range(kernel_size)], axis=0
    )
    mean = jnp.mean(windows, axis=0)
    return x - mean, mean


if __name__ == "__main__":
    key = jax.random.PRNGKey(0)

    cases = [
        ((2, 16, 8), 5),     # small default case
        ((2, 24, 7), 25),    # wide window (spans both edges), non-128 lanes
        ((3, 16, 256), 5),   # lane-dense channel-tiled path (C % 128 == 0)
    ]
    for (B, L, C), kernel_size in cases:
        key, sub = jax.random.split(key)
        x = jax.random.normal(sub, (B, L, C), dtype=jnp.float32)

        res, mean = series_decomp(x, kernel_size)
        res = jax.block_until_ready(res)
        mean = jax.block_until_ready(mean)

        res_ref, mean_ref = _reference(x, kernel_size)
        assert jnp.allclose(res, res_ref, atol=1e-5, rtol=1e-5), (B, L, C, kernel_size)
        assert jnp.allclose(mean, mean_ref, atol=1e-5, rtol=1e-5), (B, L, C, kernel_size)

    print("KERNEL_OK")
</pallas_src>

<mosaic_0001>
module attributes {stable_mosaic.version = 11 : i64} {
  func.func @_decomp_kernel(%arg0: i32, %arg1: i32, %arg2: memref<16x16xf32, #tpu.memory_space<vmem>>, %arg3: memref<1x16x8xf32, #tpu.memory_space<vmem>>, %arg4: memref<1x16x8xf32, #tpu.memory_space<vmem>>, %arg5: memref<1x16x8xf32, #tpu.memory_space<vmem>>) attributes {dimension_semantics = [#tpu.dimension_semantics<parallel>, #tpu.dimension_semantics<parallel>], iteration_bounds = array<i64: 2, 1>, scalar_prefetch = 0 : i64, scratch_operands = 0 : i64, tpu.core_type = #tpu.core_type<tc>, window_params = [{pipeline_mode = #tpu.pipeline_mode<synchronous>, transform_indices = @transform_0, window_bounds = array<i64: 16, 16>}, {transform_indices = @transform_1, window_bounds = array<i64: 1, 16, 8>}, {transform_indices = @transform_2, window_bounds = array<i64: 1, 16, 8>}, {transform_indices = @transform_3, window_bounds = array<i64: 1, 16, 8>}]} {
    %c0 = arith.constant 0 : index
    %c0_0 = arith.constant 0 : index
    %c0_1 = arith.constant 0 : index
    %0 = vector.load %arg3[%c0, %c0_0, %c0_1] : memref<1x16x8xf32, #tpu.memory_space<vmem>>, vector<1x16x8xf32>
    %1 = vector.shape_cast %0 : vector<1x16x8xf32> to vector<16x8xf32>
    %c0_2 = arith.constant 0 : index
    %c0_3 = arith.constant 0 : index
    %2 = vector.load %arg2[%c0_2, %c0_3] : memref<16x16xf32, #tpu.memory_space<vmem>>, vector<16x16xf32>
    %cst = arith.constant dense<0.000000e+00> : vector<16x8xf32>
    %3 = tpu.matmul %2, %1, %cst {dimension_numbers = #tpu.dot_dimension_numbers<[1], [0], [0], [1], [0, 0, 1, 1], [], []>, precision = #tpu.contract_precision<fp32>} : vector<16x16xf32>, vector<16x8xf32>, vector<16x8xf32> -> vector<16x8xf32>
    %cst_4 = arith.constant 2.000000e-01 : f32
    %4 = vector.broadcast %cst_4 : f32 to vector<16x8xf32>
    %5 = arith.mulf %3, %4 : vector<16x8xf32>
    %c0_5 = arith.constant 0 : index
    %c0_6 = arith.constant 0 : index
    %c0_7 = arith.constant 0 : index
    %6 = vector.load %arg5[%c0_5, %c0_6, %c0_7] : memref<1x16x8xf32, #tpu.memory_space<vmem>>, vector<1x16x8xf32>
    %7 = vector.shape_cast %6 : vector<1x16x8xf32> to vector<16x8xf32>
    %8 = vector.shape_cast %5 : vector<16x8xf32> to vector<1x16x8xf32>
    tpu.vector_store %arg5[%c0_5, %c0_6, %c0_7], %8 {strides = array<i32>} : memref<1x16x8xf32, #tpu.memory_space<vmem>>, vector<1x16x8xf32>,
    %9 = arith.subf %1, %5 : vector<16x8xf32>
    %c0_8 = arith.constant 0 : index
    %c0_9 = arith.constant 0 : index
    %c0_10 = arith.constant 0 : index
    %10 = vector.load %arg4[%c0_8, %c0_9, %c0_10] : memref<1x16x8xf32, #tpu.memory_space<vmem>>, vector<1x16x8xf32>
    %11 = vector.shape_cast %10 : vector<1x16x8xf32> to vector<16x8xf32>
    %12 = vector.shape_cast %9 : vector<16x8xf32> to vector<1x16x8xf32>
    tpu.vector_store %arg4[%c0_8, %c0_9, %c0_10], %12 {strides = array<i32>} : memref<1x16x8xf32, #tpu.memory_space<vmem>>, vector<1x16x8xf32>,
    return
  }
  func.func @transform_0(%arg0: i32, %arg1: i32) -> (i32, i32) {
    %c0_i32 = arith.constant 0 : i32
    %c0_i32_0 = arith.constant 0 : i32
    %c0_i32_1 = arith.constant 0 : i32
    return %c0_i32, %c0_i32_0 : i32, i32
  }
  func.func @transform_1(%arg0: i32, %arg1: i32) -> (i32, i32, i32) {
    %c0_i32 = arith.constant 0 : i32
    %c0_i32_0 = arith.constant 0 : i32
    return %arg0, %c0_i32, %arg1 : i32, i32, i32
  }
  func.func @transform_2(%arg0: i32, %arg1: i32) -> (i32, i32, i32) {
    %c0_i32 = arith.constant 0 : i32
    %c0_i32_0 = arith.constant 0 : i32
    return %arg0, %c0_i32, %arg1 : i32, i32, i32
  }
  func.func @transform_3(%arg0: i32, %arg1: i32) -> (i32, i32, i32) {
    %c0_i32 = arith.constant 0 : i32
    %c0_i32_0 = arith.constant 0 : i32
    return %arg0, %c0_i32, %arg1 : i32, i32, i32
  }
}

</mosaic_0001>

<bundles_post_ra>
// kernel: tpu_custom_call.1
= control target key start
LH: loop header
LB: loop body
LE: loop exit
PB: predicated region body
PF: predicated region fallthrough
CT: control target
= control target key end

     0   :  { %s651_s12 = smov 0   ;;  %s653_s13 = smov 0   ;;  %s712_s0 = inlined_call_operand.vmem [shape: f32[16,16], index: 0, kind: input, shape index: {}]   ;;  %s713_s1 = inlined_call_operand.vmem [shape: f32[2,16,8], index: 1, kind: input, shape index: {}]   ;;  %s714_s2 = inlined_call_operand.vmem [shape: f32[2,16,8], index: 2, kind: output, shape index: {0}]   ;;  %s715_s3 = inlined_call_operand.vmem [shape: f32[2,16,8], index: 3, kind: output, shape index: {1}]  }
   0x1   :  { %s655_s14 = smov 0  }
   0x2 LB: > { %s26_s15 = sadd.s32 1, %s625_s13  ;;  %p567_p0 = scmp.ge.s32.totalorder %s629_s14, 1  ;;  %s629_s14 = sphi %s655_s14, %s14_s14   ;;  %s625_s13 = sphi %s653_s13, %s717_s13   ;;  %s621_s12 = sphi %s651_s12, %s716_s12  }
   0x3   : > { %p28_p1 = scmp.ge.s32.totalorder %s26_s15, 2  ;;  %p161_p2 = scmp.lt.s32.totalorder %s629_s14, 3 }
   0x5   : > { %s719_s15 = smov (%p28_p1, %s26_s15), 0  ;;  %p162_p3 = pnand %p567_p0, %p161_p2 }
   0x6   : > { %p199_p4 = scmp.lt.s32.totalorder (!%p162_p3), %s621_s12, 1 }
   0x7   : > { %165 = sbr.rel (%p162_p3) target bundleno = 188 (0xbc), region = 28 }
   0xc   : > { %v226_v0 = vld [vmem:[%s712_s0 + $0x8] sm:$0xff]  ;;  %vm227_vm0 = vcmask 130048   ;;  %v225_v1 = vld [vmem:[%s712_s0] sm:$0xff]  ;;  %s721_s12 = smov (!%p199_p4, %s621_s12), 1  ;;  %vm426_vm1 = vcmask 64512  }
   0xd   : > { %v232_v2 = vsel %vm227_vm0, %v226_v0, 0  ;;  %v229_v3 = vsel %vm227_vm0, %v225_v1, 0  ;;  %s675_s20 = sshll.u32 %s721_s12, 4 }
   0xe   : > { %v260_v4 = vand.u32 4294901760, %v232_v2  ;;  %v252_v5 = vand.u32 4294901760, %v229_v3  ;;  %s206_s23 = scalar_lea.vmem %s713_s1, %s675_s20  ;;  %s222_s26 = scalar_lea.vmem %s715_s3, %s675_s20 }
   0xf   : > { %v681_v8 = vld [vmem:[%s206_s23 + $0x8] sm:$0xff]  ;;  %v683_v9 = vld [vmem:[%s206_s23] sm:$0xff]  ;;  %s214_s29 = scalar_lea.vmem %s714_s2, %s675_s20 }
  0x10   : > { %v261_v6 = vsub.f32 %v232_v2, %v260_v4  ;;  %v253_v7 = vsub.f32 %v229_v3, %v252_v5  ;;  %v248_v12 = vand.u32 4294901760, %v681_v8  ;;  %v250_v13 = vand.u32 4294901760, %v683_v9 }
  0x12   : > { %v262_v10 = vand.u32 4294901760, %v261_v6  ;;  %v254_v11 = vand.u32 4294901760, %v253_v7  ;;  %579 = vmatpush.msra.mxu2 %v248_v12  ;;  %v284_v16 = vsub.f32 %v681_v8, %v248_v12  ;;  %v290_v17 = vsub.f32 %v683_v9, %v250_v13  ;;  %249 = vmatpush.msra.mxu0 %v248_v12 }
  0x14   : > { %v263_v14 = vsub.f32 %v261_v6, %v262_v10  ;;  %v255_v15 = vsub.f32 %v253_v7, %v254_v11  ;;  %580 = vmatpush.msra.mxu2 %v250_v13  ;;  %v285_v20 = vand.u32 4294901760, %v284_v16  ;;  %v291_v21 = vand.u32 4294901760, %v290_v17  ;;  %251 = vmatpush.msra.mxu0 %v250_v13 }
  0x16   : > { %v264_v18 = vand.u32 4294901760, %v263_v14  ;;  %v256_v19 = vand.u32 4294901760, %v255_v15  ;;  %v286_v22 = vsub.f32 %v284_v16, %v285_v20  ;;  %320 = vmatpush.msrb.mxu2 %v284_v16  ;;  %v292_v23 = vsub.f32 %v290_v17, %v291_v21  ;;  %383 = vmatpush.msrb.mxu0 %v285_v20 }
  0x18   : > { %265 = vmatmul.f32.vlgmr.msra.gmra.mxu2 %v264_v18  ;;  %257 = vmatmul.f32.vlgmr.msra.gmra.mxu0 %v256_v19  ;;  %v287_v24 = vand.u32 4294901760, %v286_v22  ;;  %v293_v25 = vand.u32 4294901760, %v292_v23 }
  0x19   : > { %323 = vmatpush.msrb.mxu2 %v290_v17  ;;  %387 = vmatpush.msrb.mxu0 %v291_v21 }
  0x1a   : > { %581 = vmatpush.msra.mxu3 %v287_v24  ;;  %288 = vmatpush.msra.mxu1 %v287_v24 }
  0x1c   : > { %582 = vmatpush.msra.mxu3 %v293_v25  ;;  %294 = vmatpush.msra.mxu1 %v293_v25 }
  0x1d   : > { %300 = vmatmul.f32.vlgmr.msra.gmra.mxu3 %v260_v4  ;;  %296 = vmatmul.f32.vlgmr.msra.gmra.mxu1 %v252_v5 }
  0x1e   : > { %350 = vmatpush.msrb.mxu3 %v248_v12  ;;  %412 = vmatpush.msrb.mxu1 %v248_v12 }
  0x20   : > { %326 = vmatmul.f32.vlgmr.msrb.gmra.mxu2 %v253_v7  ;;  %389 = vmatmul.f32.vlgmr.msrb.gmra.mxu0 %v252_v5 }
  0x21   : > { %352 = vmatpush.msrb.mxu3 %v250_v13  ;;  %414 = vmatpush.msrb.mxu1 %v250_v13 }
  0x25   : > { %356 = vmatmul.f32.vlgmr.msrb.gmra.mxu3 %v254_v11  ;;  %416 = vmatmul.f32.vlgmr.msrb.gmra.mxu1 %v252_v5 }
  0x28   : > { %331 = vmatmul.f32.gmra.mxu2 %v261_v6  ;;  %393 = vmatmul.f32.gmra.mxu0 %v260_v4 }
  0x2d   : > { %362 = vmatmul.f32.gmra.mxu3 %v262_v10  ;;  %420 = vmatmul.f32.gmra.mxu1 %v260_v4 }
  0x95   : > { %v258_v27 = vpop.f32.mrf.mxu0 }
  0x9a   : > { %v297_v29 = vpop.f32.mrf.mxu1 }
  0x9b   : > { %v266_v26 = vpop.f32.mrf.mxu2  ;;  %v298_v31 = vadd.f32 %v297_v29, %v258_v27 }
  0x9d   : > { %v390_v32 = vpop.f32.mrf.mxu0 }
  0xa0   : > { %v301_v28 = vpop.f32.mrf.mxu3 }
  0xa1   : > { %v302_v39 = vadd.f32 %v301_v28, %v266_v26 }
  0xa2   : > { %v417_v35 = vpop.f32.mrf.mxu1 }
  0xa3   : > { %v327_v30 = vpop.f32.mrf.mxu2 }
  0xa4   : > { %v328_v33 = vadd.f32 %v327_v30, %v298_v31 }
  0xa5   : > { %v394_v44 = vpop.f32.mrf.mxu0 }
  0xa8   : > { %v357_v34 = vpop.f32.mrf.mxu3 }
  0xa9   : > { %v358_v36 = vadd.f32 %v357_v34, %v328_v33 }
  0xaa   : > { %v421_v47 = vpop.f32.mrf.mxu1 }
  0xab   : > { %v391_v37 = vadd.f32 %v390_v32, %v358_v36  ;;  %v332_v38 = vpop.f32.mrf.mxu2 }
  0xac   : > { %v333_v41 = vadd.f32 %v332_v38, %v302_v39 }
  0xad   : > { %v418_v40 = vadd.f32 %v417_v35, %v391_v37 }
  0xaf   : > { %v424_v42 = vmul.f32 0.2, %v418_v40 }
  0xb0   : > { %v363_v43 = vpop.f32.mrf.mxu3 }
  0xb1   : > { %427 = vst.msk [vmem:[%s222_s26] sm:$0xff] %vm426_vm1, %v424_v42  ;;  %v429_v45 = vsub.f32 %v683_v9, %v424_v42  ;;  %v364_v46 = vadd.f32 %v363_v43, %v333_v41 }
  0xb3   : > { %431 = vst.msk [vmem:[%s214_s29] sm:$0xff] %vm426_vm1, %v429_v45  ;;  %v395_v48 = vadd.f32 %v394_v44, %v364_v46 }
  0xb5   : > { %v422_v49 = vadd.f32 %v421_v47, %v395_v48 }
  0xb7   : > { %v425_v50 = vmul.f32 0.2, %v422_v49 }
  0xb9   : > { %428 = vst.msk [vmem:[%s222_s26 + $0x8] sm:$0xff] %vm426_vm1, %v425_v50  ;;  %v430_v51 = vsub.f32 %v681_v8, %v425_v50 }
  0xbb   : > { %432 = vst.msk [vmem:[%s214_s29 + $0x8] sm:$0xff] %vm426_vm1, %v430_v51 }
  0xbc PF: > { %s14_s14 = sadd.s32 1, %s629_s14   ;;  %s716_s12 = smov %s625_s13 }
  0xbd   : > { %p11_p5 = scmp.ge.s32.totalorder %s14_s14, 4   ;;  %s717_s13 = smov %s719_s15 }
  0xbf   :  { %13 = sbr.rel (!%p11_p5) target bundleno = 2 (0x2), region = 70 }

</bundles_post_ra>
